<compile_context>
chip_gen: v6e
topology: v6e:2x2x1
jax: 0.10.0
libtpu: 0.0.40
codegen_flags: <defaults>
</compile_context>

<pallas_src>
import jax
import jax.numpy as jnp
from jax import lax
from jax.experimental import pallas as pl
from jax.experimental.pallas import tpu as pltpu


def autopad(k, p=None, d=1):
    """Same autopad as ultralytics."""
    if d > 1:
        k = d * (k - 1) + 1
    if p is None:
        p = k // 2
    return p


def _round_up(x, m):
    return (x + m - 1) // m * m


def _make_gsconv_kernel(offsets, tile_m):
    """Kernel factory: `offsets` are the static lane offsets of the k*k taps
    inside the halo buffer; a single dot (offsets == (0,)) covers 1x1 convs and
    the strided fallback."""
    n_taps = len(offsets)

    def kernel(x_hbm, w_ref, b_ref, o_ref, xbuf, sem):
        n = pl.program_id(0)
        m = pl.program_id(1)
        nm = pl.num_programs(1)
        buf_lanes = xbuf.shape[2]
        slot = m % 2

        def start_fetch(mm, sl):
            pltpu.make_async_copy(
                x_hbm.at[n, :, pl.ds(mm * tile_m, buf_lanes)],
                xbuf.at[sl], sem.at[sl]).start()

        # Cold fetch for the first tile of every image.
        @pl.when(m == 0)
        def _():
            start_fetch(0, 0)

        # Wait for the tile we are about to consume.
        pltpu.make_async_copy(
            x_hbm.at[n, :, pl.ds(0, buf_lanes)],
            xbuf.at[slot], sem.at[slot]).wait()

        # Prefetch the next tile of this image while we compute this one.
        @pl.when(m + 1 < nm)
        def _():
            start_fetch(m + 1, 1 - slot)

        x_cur = xbuf.at[slot]
        acc = jnp.zeros((w_ref.shape[1], tile_m), jnp.float32)
        for t in range(n_taps):  # static unroll over the k*k taps
            acc = acc + jnp.dot(
                w_ref[t], x_cur[:, pl.ds(offsets[t], tile_m)],
                preferred_element_type=jnp.float32)
        y = acc + b_ref[...]                                    # folded BN bias (f32)
        y = y * pl.reciprocal(1.0 + jnp.exp(-y), approx=True)   # SiLU (exp + rcp on EUP)
        o_ref[0] = y.astype(o_ref.dtype)

    return kernel


def gsconv_pallas(x, w_group, w_point, gamma, beta, mean, var, *,
                  k=1, s=1, p=None, g=2, d=1, eps=1e-5,
                  compute_dtype=jnp.bfloat16, out_dtype=None, max_tile_m=4096):
    N, C1, H, W = x.shape
    C2 = w_group.shape[0]
    g = 1 if C1 % g != 0 else g
    assert C2 % g == 0, "out channels must be divisible by groups"
    pad = autopad(k, p, d)
    C1g, C2g = C1 // g, C2 // g
    Ho = (H + 2 * pad - d * (k - 1) - 1) // s + 1
    Wo = (W + 2 * pad - d * (k - 1) - 1) // s + 1
    out_dtype = compute_dtype if out_dtype is None else out_dtype
    C2p = _round_up(C2, 8)

    # ---- fold group conv, pointwise conv and BN scale into per-tap weights ----
    wg = w_group.astype(jnp.float32).reshape(g, C2g, C1g, k, k)
    wp = w_point.astype(jnp.float32).reshape(C2, g, C2g)
    w_fold = jnp.einsum('gcihw,ogc->hwgio', wg, wp).reshape(k, k, C1, C2)
    inv_std = 1.0 / jnp.sqrt(var.astype(jnp.float32) + eps)
    scale = gamma.astype(jnp.float32) * inv_std
    bias = beta.astype(jnp.float32) - mean.astype(jnp.float32) * scale
    w_fold = w_fold * scale                                    # fold BN scale
    b_col = jnp.pad(bias, (0, C2p - C2)).reshape(C2p, 1)       # (C2p, 1) f32

    xq = x.astype(compute_dtype)

    if k == 1:
        # 1x1 conv: pure channel mixing (stride = plain subsample in the wrapper).
        if pad > 0:
            xq = jnp.pad(xq, ((0, 0), (0, 0), (pad, pad), (pad, pad)))
        if s > 1:
            xq = xq[:, :, ::s, ::s]
        x_sp = xq                                              # (N, C1, Ho, Wo)
        Cin, offsets, row_w = C1, [0], Wo
        w_taps = jnp.transpose(w_fold, (0, 1, 3, 2)).reshape(1, C2, C1)
    elif s == 1:
        # Halo / flat-shift path: output lattice has row stride Wp (padded width);
        # the k*k taps are constant lane offsets on the flattened padded input.
        Wp = W + 2 * pad
        x_sp = None                                            # built after tile sizing
        Cin, row_w = C1, Wp
        offsets = [kh * d * Wp + kw * d for kh in range(k) for kw in range(k)]
        w_taps = jnp.transpose(w_fold, (0, 1, 3, 2)).reshape(k * k, C2, C1)
    else:
        # TODO(synk): strided k>1 convs still materialize a wrapper im2col; extend
        # the halo path with strided in-VMEM tap reads to cover s>1 too.
        Kt = k * k * C1
        xp = jnp.pad(xq, ((0, 0), (0, 0), (pad, pad), (pad, pad)))
        taps = [xp[:, :, kh * d:kh * d + s * (Ho - 1) + 1:s,
                      kw * d:kw * d + s * (Wo - 1) + 1:s]
                for kh in range(k) for kw in range(k)]
        x_sp = jnp.stack(taps, axis=1).reshape(N, Kt, Ho, Wo)
        Cin, offsets, row_w = Kt, [0], Wo
        w_taps = w_fold.reshape(Kt, C2).T.reshape(1, C2, Kt)

    T = len(offsets)
    max_off = max(offsets)
    w_taps = jnp.pad(w_taps, ((0, 0), (0, C2p - C2), (0, 0))).astype(compute_dtype)
    L_out = Ho * row_w

    # ---- generation-aware tile sizing & VMEM budget ----
    try:
        vmem_cap = int(pltpu.get_tpu_info().vmem_capacity_bytes)
    except Exception:
        vmem_cap = 64 * 2**20                                  # conservative default
    budget = int(0.75 * vmem_cap)                              # leave compiler headroom
    bpe_in = jnp.dtype(compute_dtype).itemsize
    bpe_out = jnp.dtype(out_dtype).itemsize
    resident = T * C2p * Cin * bpe_in + C2p * 4
    per_lane = 2 * Cin * bpe_in + 2 * C2p * bpe_out + C2p * 4  # in dbuf + out dbuf + f32 acc
    avail = max(2 * 2**20, budget // 2 - resident)
    tile_cap = max(512, min(max_tile_m, avail // per_lane // 128 * 128))
    if L_out <= 128:
        tile_m = L_out                                         # full extent (exempt from 128 rule)
    else:
        tile_m = min(tile_cap, (L_out // 128) * 128)           # never exceeds the array extent
    halo = _round_up(max_off, 128) if max_off > 0 else 0
    buf_lanes = tile_m + halo
    n_tiles = -(-L_out // tile_m)
    L_need = (n_tiles - 1) * tile_m + buf_lanes                # manual DMA must stay in-bounds

    # ---- build the flat input (single pad; no k^2 inflation on the halo path) ----
    if x_sp is None:
        Hp = H + 2 * pad
        extra = max(0, -(-(L_need - Hp * row_w) // row_w))     # extra zero rows for DMA slack
        xq2 = jnp.pad(xq, ((0, 0), (0, 0), (pad, pad + extra), (pad, pad)))
        x_flat = xq2.reshape(N, C1, (Hp + extra) * row_w)
    else:
        x_flat = x_sp.reshape(N, Cin, L_out)
        if L_need > L_out:
            x_flat = jnp.pad(x_flat, ((0, 0), (0, 0), (0, L_need - L_out)))

    vmem_est = (resident + 2 * Cin * buf_lanes * bpe_in
                + 2 * C2p * tile_m * bpe_out + C2p * tile_m * 4)
    vmem_limit = int(min(budget, max(16 * 2**20, 2 * vmem_est)))

    out = pl.pallas_call(
        _make_gsconv_kernel(tuple(offsets), tile_m),
        out_shape=jax.ShapeDtypeStruct((N, C2p, L_out), out_dtype),
        grid_spec=pltpu.PrefetchScalarGridSpec(
            num_scalar_prefetch=0,
            grid=(N, n_tiles),
            in_specs=[
                pl.BlockSpec(memory_space=pl.ANY),                    # flat input, manual halo DMA
                pl.BlockSpec((T, C2p, Cin), lambda n, m: (0, 0, 0)),  # resident folded tap weights
                pl.BlockSpec((C2p, 1), lambda n, m: (0, 0)),          # resident BN bias
            ],
            out_specs=pl.BlockSpec((1, C2p, tile_m), lambda n, m: (n, 0, m)),
            scratch_shapes=[
                pltpu.VMEM((2, Cin, buf_lanes), compute_dtype),       # double-buffered halo tiles
                pltpu.SemaphoreType.DMA((2,)),
            ]),
        compiler_params=pltpu.CompilerParams(
            dimension_semantics=("arbitrary", "arbitrary"),           # manual dbuf needs order
            vmem_limit_bytes=vmem_limit),
    )(x_flat, w_taps, b_col)

    y = out.reshape(N, C2p, Ho, row_w)
    if C2p != C2 or row_w != Wo:
        y = y[:, :C2, :, :Wo]
    return y


def gsconv_ref(x, wg, wp, gamma, beta, mean, var, *, k, s, p, g, d, eps=1e-5):
    """Pure-JAX f32 reference (matches the PyTorch module in eval mode)."""
    pad = autopad(k, p, d)
    g = 1 if x.shape[1] % g != 0 else g
    y = lax.conv_general_dilated(
        x, wg, window_strides=(s, s), padding=[(pad, pad), (pad, pad)],
        rhs_dilation=(d, d), dimension_numbers=("NCHW", "OIHW", "NCHW"),
        feature_group_count=g, precision=lax.Precision.HIGHEST)
    y = lax.conv_general_dilated(
        y, wp, window_strides=(1, 1), padding="VALID",
        dimension_numbers=("NCHW", "OIHW", "NCHW"),
        precision=lax.Precision.HIGHEST)
    inv_std = 1.0 / jnp.sqrt(var + eps)
    sc = (gamma * inv_std)[None, :, None, None]
    b = (beta - mean * gamma * inv_std)[None, :, None, None]
    y = y * sc + b
    return y * jax.nn.sigmoid(y)


if __name__ == "__main__":
    key = jax.random.PRNGKey(0)

    def make_case(ck, N, C1, H, W, C2, k, s, g, d):
        kx, kwg, kwp, kg, kb, km, kv = jax.random.split(ck, 7)
        gg = 1 if C1 % g != 0 else g
        x = jax.random.normal(kx, (N, C1, H, W), jnp.float32)
        w_group = jax.random.normal(kwg, (C2, C1 // gg, k, k), jnp.float32) * 0.2
        w_point = jax.random.normal(kwp, (C2, C2, 1, 1), jnp.float32) * 0.2
        gamma = 1.0 + 0.1 * jax.random.normal(kg, (C2,), jnp.float32)
        beta = 0.1 * jax.random.normal(kb, (C2,), jnp.float32)
        mean = 0.1 * jax.random.normal(km, (C2,), jnp.float32)
        var = jax.random.uniform(kv, (C2,), jnp.float32, minval=0.5, maxval=1.5)
        return x, w_group, w_point, gamma, beta, mean, var

    cases = [
        dict(N=2, C1=4, H=16, W=16, C2=8, k=3, s=1, g=2, d=1),   # halo / no-im2col path
        dict(N=2, C1=4, H=16, W=16, C2=8, k=1, s=1, g=2, d=1),   # 1x1 grouped conv path
        dict(N=2, C1=4, H=16, W=16, C2=8, k=3, s=2, g=2, d=1),   # strided fallback path
    ]
    keys = jax.random.split(key, len(cases))
    for cfg, ck in zip(cases, keys):
        args = make_case(ck, cfg["N"], cfg["C1"], cfg["H"], cfg["W"],
                         cfg["C2"], cfg["k"], cfg["s"], cfg["g"], cfg["d"])
        out = gsconv_pallas(*args, k=cfg["k"], s=cfg["s"], p=None,
                            g=cfg["g"], d=cfg["d"])
        out = jax.block_until_ready(out)
        ref = gsconv_ref(*args, k=cfg["k"], s=cfg["s"], p=None,
                         g=cfg["g"], d=cfg["d"])
        assert out.shape == ref.shape, (out.shape, ref.shape)
        out_f = out.astype(jnp.float32)
        max_err = float(jnp.max(jnp.abs(out_f - ref)))
        # bf16 inputs/weights/output, f32 accumulation vs f32-HIGHEST reference
        assert jnp.allclose(out_f, ref, rtol=3e-2, atol=5e-2), \
            f"cfg={cfg} max abs err {max_err}"
    print("KERNEL_OK")
</pallas_src>

<mosaic_0001>
module attributes {stable_mosaic.version = 11 : i64} {
  func.func @kernel(%arg0: i32, %arg1: i32, %arg2: memref<2x4x648xbf16, #tpu.memory_space<any>>, %arg3: memref<9x8x4xbf16, #tpu.memory_space<vmem>>, %arg4: memref<8x1xf32, #tpu.memory_space<vmem>>, %arg5: memref<1x8x256xbf16, #tpu.memory_space<vmem>>, %arg6: memref<2x4x384xbf16, #tpu.memory_space<vmem>>, %arg7: memref<2x!tpu.dma_semaphore, #tpu.memory_space<semaphore_mem>>) attributes {dimension_semantics = [#tpu.dimension_semantics<arbitrary>, #tpu.dimension_semantics<arbitrary>], iteration_bounds = array<i64: 2, 2>, scalar_prefetch = 0 : i64, scratch_operands = 2 : i64, tpu.core_type = #tpu.core_type<tc>, window_params = [{}, {pipeline_mode = #tpu.pipeline_mode<synchronous>, transform_indices = @transform_1, window_bounds = array<i64: 9, 8, 4>}, {pipeline_mode = #tpu.pipeline_mode<synchronous>, transform_indices = @transform_2, window_bounds = array<i64: 8, 1>}, {transform_indices = @transform_3, window_bounds = array<i64: 1, 8, 256>}]} {
    %c2_i32 = arith.constant 2 : i32
    %c0_i32 = arith.constant 0 : i32
    %0 = arith.cmpi eq, %c2_i32, %c0_i32 : i32
    %c1_i32 = arith.constant 1 : i32
    %1 = arith.select %0, %c1_i32, %c2_i32 : i32
    %2 = arith.remsi %arg1, %1 : i32
    %c0_i32_0 = arith.constant 0 : i32
    %3 = arith.cmpi ne, %2, %c0_i32_0 : i32
    %c0_i32_1 = arith.constant 0 : i32
    %4 = arith.cmpi slt, %2, %c0_i32_1 : i32
    %c0_i32_2 = arith.constant 0 : i32
    %5 = arith.cmpi slt, %1, %c0_i32_2 : i32
    %6 = arith.xori %4, %5 : i1
    %7 = arith.andi %6, %3 : i1
    %8 = arith.addi %2, %1 : i32
    %9 = arith.select %7, %8, %2 : i32
    %c0_i32_3 = arith.constant 0 : i32
    %10 = arith.cmpi eq, %arg1, %c0_i32_3 : i32
    %11 = arith.extui %10 : i1 to i32
    %c0_i32_4 = arith.constant 0 : i32
    %12 = arith.cmpi ne, %11, %c0_i32_4 : i32
    scf.if %12 {
      %c0_i32_76 = arith.constant 0 : i32
      %c0_i32_77 = arith.constant 0 : i32
      %c0_i32_78 = arith.constant 0 : i32
      %c0_i32_79 = arith.constant 0 : i32
      %101 = tpu.memref_slice %arg2[%arg0, %c0_i32_78, %c0_i32_79] : memref<2x4x648xbf16, #tpu.memory_space<any>> -> memref<1x4x384xbf16, #tpu.memory_space<any>>
      %102 = tpu.memref_squeeze %101 : memref<1x4x384xbf16, #tpu.memory_space<any>> -> memref<4x384xbf16, #tpu.memory_space<any>>
      %c0_i32_80 = arith.constant 0 : i32
      %c0_i32_81 = arith.constant 0 : i32
      %103 = tpu.memref_slice %arg6[%c0_i32_76, %c0_i32_80, %c0_i32_81] : memref<2x4x384xbf16, #tpu.memory_space<vmem>> -> memref<1x4x384xbf16, #tpu.memory_space<vmem>>
      %104 = tpu.memref_squeeze %103 : memref<1x4x384xbf16, #tpu.memory_space<vmem>> -> memref<4x384xbf16, #tpu.memory_space<vmem>>
      %105 = tpu.memref_slice %arg7[%c0_i32_77] : memref<2x!tpu.dma_semaphore, #tpu.memory_space<semaphore_mem>> -> memref<1x!tpu.dma_semaphore, #tpu.memory_space<semaphore_mem>>
      %106 = tpu.memref_squeeze %105 : memref<1x!tpu.dma_semaphore, #tpu.memory_space<semaphore_mem>> -> memref<!tpu.dma_semaphore, #tpu.memory_space<semaphore_mem>>
      tpu.enqueue_dma source(%102 : memref<4x384xbf16, #tpu.memory_space<any>>) target(%104 : memref<4x384xbf16, #tpu.memory_space<vmem>>) target_semaphore(%106 : memref<!tpu.dma_semaphore, #tpu.memory_space<semaphore_mem>>)
    } else {
    }
    %c0_i32_5 = arith.constant 0 : i32
    %c0_i32_6 = arith.constant 0 : i32
    %13 = tpu.memref_slice %arg2[%arg0, %c0_i32_5, %c0_i32_6] : memref<2x4x648xbf16, #tpu.memory_space<any>> -> memref<1x4x384xbf16, #tpu.memory_space<any>>
    %14 = tpu.memref_squeeze %13 : memref<1x4x384xbf16, #tpu.memory_space<any>> -> memref<4x384xbf16, #tpu.memory_space<any>>
    %c0_i32_7 = arith.constant 0 : i32
    %c0_i32_8 = arith.constant 0 : i32
    %15 = tpu.memref_slice %arg6[%9, %c0_i32_7, %c0_i32_8] : memref<2x4x384xbf16, #tpu.memory_space<vmem>> -> memref<1x4x384xbf16, #tpu.memory_space<vmem>>
    %16 = tpu.memref_squeeze %15 : memref<1x4x384xbf16, #tpu.memory_space<vmem>> -> memref<4x384xbf16, #tpu.memory_space<vmem>>
    %17 = tpu.memref_slice %arg7[%9] : memref<2x!tpu.dma_semaphore, #tpu.memory_space<semaphore_mem>> -> memref<1x!tpu.dma_semaphore, #tpu.memory_space<semaphore_mem>>
    %18 = tpu.memref_squeeze %17 : memref<1x!tpu.dma_semaphore, #tpu.memory_space<semaphore_mem>> -> memref<!tpu.dma_semaphore, #tpu.memory_space<semaphore_mem>>
    tpu.wait_dma2 semaphore(%18 : memref<!tpu.dma_semaphore, #tpu.memory_space<semaphore_mem>>) src(%14 : memref<4x384xbf16, #tpu.memory_space<any>>) dst(%16 : memref<4x384xbf16, #tpu.memory_space<vmem>>)
    %c1_i32_9 = arith.constant 1 : i32
    %19 = arith.addi %arg1, %c1_i32_9 : i32
    %c2_i32_10 = arith.constant 2 : i32
    %20 = arith.cmpi slt, %19, %c2_i32_10 : i32
    %21 = arith.extui %20 : i1 to i32
    %c0_i32_11 = arith.constant 0 : i32
    %22 = arith.cmpi ne, %21, %c0_i32_11 : i32
    scf.if %22 {
      %c1_i32_76 = arith.constant 1 : i32
      %101 = arith.addi %arg1, %c1_i32_76 : i32
      %c1_i32_77 = arith.constant 1 : i32
      %102 = arith.subi %c1_i32_77, %9 : i32
      %c256_i32 = arith.constant 256 : i32
      %103 = arith.muli %101, %c256_i32 : i32
      %c0_i32_78 = arith.constant 0 : i32
      %104 = tpu.memref_slice %arg2[%arg0, %c0_i32_78, %103] : memref<2x4x648xbf16, #tpu.memory_space<any>> -> memref<1x4x384xbf16, #tpu.memory_space<any>>
      %105 = tpu.memref_squeeze %104 : memref<1x4x384xbf16, #tpu.memory_space<any>> -> memref<4x384xbf16, #tpu.memory_space<any>>
      %c0_i32_79 = arith.constant 0 : i32
      %c0_i32_80 = arith.constant 0 : i32
      %106 = tpu.memref_slice %arg6[%102, %c0_i32_79, %c0_i32_80] : memref<2x4x384xbf16, #tpu.memory_space<vmem>> -> memref<1x4x384xbf16, #tpu.memory_space<vmem>>
      %107 = tpu.memref_squeeze %106 : memref<1x4x384xbf16, #tpu.memory_space<vmem>> -> memref<4x384xbf16, #tpu.memory_space<vmem>>
      %108 = tpu.memref_slice %arg7[%102] : memref<2x!tpu.dma_semaphore, #tpu.memory_space<semaphore_mem>> -> memref<1x!tpu.dma_semaphore, #tpu.memory_space<semaphore_mem>>
      %109 = tpu.memref_squeeze %108 : memref<1x!tpu.dma_semaphore, #tpu.memory_space<semaphore_mem>> -> memref<!tpu.dma_semaphore, #tpu.memory_space<semaphore_mem>>
      tpu.enqueue_dma source(%105 : memref<4x384xbf16, #tpu.memory_space<any>>) target(%107 : memref<4x384xbf16, #tpu.memory_space<vmem>>) target_semaphore(%109 : memref<!tpu.dma_semaphore, #tpu.memory_space<semaphore_mem>>)
    } else {
    }
    %cst = arith.constant 0.000000e+00 : f32
    %23 = vector.broadcast %cst : f32 to vector<8x256xf32>
    %c0 = arith.constant 0 : index
    %c0_12 = arith.constant 0 : index
    %c0_13 = arith.constant 0 : index
    %24 = vector.load %arg3[%c0, %c0_12, %c0_13] : memref<9x8x4xbf16, #tpu.memory_space<vmem>>, vector<1x8x4xbf16>
    %25 = vector.shape_cast %24 : vector<1x8x4xbf16> to vector<8x4xbf16>
    %c0_i32_14 = arith.constant 0 : i32
    %c0_i32_15 = arith.constant 0 : i32
    %26 = tpu.memref_slice %arg6[%9, %c0_i32_14, %c0_i32_15] : memref<2x4x384xbf16, #tpu.memory_space<vmem>> -> memref<1x4x384xbf16, #tpu.memory_space<vmem>>
    %27 = tpu.memref_squeeze %26 : memref<1x4x384xbf16, #tpu.memory_space<vmem>> -> memref<4x384xbf16, #tpu.memory_space<vmem>>
    %c0_16 = arith.constant 0 : index
    %c0_17 = arith.constant 0 : index
    %28 = vector.load %27[%c0_16, %c0_17] : memref<4x384xbf16, #tpu.memory_space<vmem>>, vector<4x256xbf16>
    %cst_18 = arith.constant dense<0.000000e+00> : vector<8x256xf32>
    %29 = tpu.matmul %25, %28, %cst_18 {dimension_numbers = #tpu.dot_dimension_numbers<[1], [0], [0], [1], [0, 0, 1, 1], [], []>} : vector<8x4xbf16>, vector<4x256xbf16>, vector<8x256xf32> -> vector<8x256xf32>
    %30 = arith.addf %23, %29 : vector<8x256xf32>
    %c1 = arith.constant 1 : index
    %c0_19 = arith.constant 0 : index
    %c0_20 = arith.constant 0 : index
    %31 = vector.load %arg3[%c1, %c0_19, %c0_20] : memref<9x8x4xbf16, #tpu.memory_space<vmem>>, vector<1x8x4xbf16>
    %32 = vector.shape_cast %31 : vector<1x8x4xbf16> to vector<8x4xbf16>
    %c0_i32_21 = arith.constant 0 : i32
    %c0_i32_22 = arith.constant 0 : i32
    %33 = tpu.memref_slice %arg6[%9, %c0_i32_21, %c0_i32_22] : memref<2x4x384xbf16, #tpu.memory_space<vmem>> -> memref<1x4x384xbf16, #tpu.memory_space<vmem>>
    %34 = tpu.memref_squeeze %33 : memref<1x4x384xbf16, #tpu.memory_space<vmem>> -> memref<4x384xbf16, #tpu.memory_space<vmem>>
    %c0_23 = arith.constant 0 : index
    %c1_24 = arith.constant 1 : index
    %35 = vector.load %34[%c0_23, %c1_24] : memref<4x384xbf16, #tpu.memory_space<vmem>>, vector<4x256xbf16>
    %cst_25 = arith.constant dense<0.000000e+00> : vector<8x256xf32>
    %36 = tpu.matmul %32, %35, %cst_25 {dimension_numbers = #tpu.dot_dimension_numbers<[1], [0], [0], [1], [0, 0, 1, 1], [], []>} : vector<8x4xbf16>, vector<4x256xbf16>, vector<8x256xf32> -> vector<8x256xf32>
    %37 = arith.addf %30, %36 : vector<8x256xf32>
    %c2 = arith.constant 2 : index
    %c0_26 = arith.constant 0 : index
    %c0_27 = arith.constant 0 : index
    %38 = vector.load %arg3[%c2, %c0_26, %c0_27] : memref<9x8x4xbf16, #tpu.memory_space<vmem>>, vector<1x8x4xbf16>
    %39 = vector.shape_cast %38 : vector<1x8x4xbf16> to vector<8x4xbf16>
    %c0_i32_28 = arith.constant 0 : i32
    %c0_i32_29 = arith.constant 0 : i32
    %40 = tpu.memref_slice %arg6[%9, %c0_i32_28, %c0_i32_29] : memref<2x4x384xbf16, #tpu.memory_space<vmem>> -> memref<1x4x384xbf16, #tpu.memory_space<vmem>>
    %41 = tpu.memref_squeeze %40 : memref<1x4x384xbf16, #tpu.memory_space<vmem>> -> memref<4x384xbf16, #tpu.memory_space<vmem>>
    %c0_30 = arith.constant 0 : index
    %c2_31 = arith.constant 2 : index
    %42 = vector.load %41[%c0_30, %c2_31] : memref<4x384xbf16, #tpu.memory_space<vmem>>, vector<4x256xbf16>
    %cst_32 = arith.constant dense<0.000000e+00> : vector<8x256xf32>
    %43 = tpu.matmul %39, %42, %cst_32 {dimension_numbers = #tpu.dot_dimension_numbers<[1], [0], [0], [1], [0, 0, 1, 1], [], []>} : vector<8x4xbf16>, vector<4x256xbf16>, vector<8x256xf32> -> vector<8x256xf32>
    %44 = arith.addf %37, %43 : vector<8x256xf32>
    %c3 = arith.constant 3 : index
    %c0_33 = arith.constant 0 : index
    %c0_34 = arith.constant 0 : index
    %45 = vector.load %arg3[%c3, %c0_33, %c0_34] : memref<9x8x4xbf16, #tpu.memory_space<vmem>>, vector<1x8x4xbf16>
    %46 = vector.shape_cast %45 : vector<1x8x4xbf16> to vector<8x4xbf16>
    %c0_i32_35 = arith.constant 0 : i32
    %c0_i32_36 = arith.constant 0 : i32
    %47 = tpu.memref_slice %arg6[%9, %c0_i32_35, %c0_i32_36] : memref<2x4x384xbf16, #tpu.memory_space<vmem>> -> memref<1x4x384xbf16, #tpu.memory_space<vmem>>
    %48 = tpu.memref_squeeze %47 : memref<1x4x384xbf16, #tpu.memory_space<vmem>> -> memref<4x384xbf16, #tpu.memory_space<vmem>>
    %c0_37 = arith.constant 0 : index
    %c18 = arith.constant 18 : index
    %49 = vector.load %48[%c0_37, %c18] : memref<4x384xbf16, #tpu.memory_space<vmem>>, vector<4x256xbf16>
    %cst_38 = arith.constant dense<0.000000e+00> : vector<8x256xf32>
    %50 = tpu.matmul %46, %49, %cst_38 {dimension_numbers = #tpu.dot_dimension_numbers<[1], [0], [0], [1], [0, 0, 1, 1], [], []>} : vector<8x4xbf16>, vector<4x256xbf16>, vector<8x256xf32> -> vector<8x256xf32>
    %51 = arith.addf %44, %50 : vector<8x256xf32>
    %c4 = arith.constant 4 : index
    %c0_39 = arith.constant 0 : index
    %c0_40 = arith.constant 0 : index
    %52 = vector.load %arg3[%c4, %c0_39, %c0_40] : memref<9x8x4xbf16, #tpu.memory_space<vmem>>, vector<1x8x4xbf16>
    %53 = vector.shape_cast %52 : vector<1x8x4xbf16> to vector<8x4xbf16>
    %c0_i32_41 = arith.constant 0 : i32
    %c0_i32_42 = arith.constant 0 : i32
    %54 = tpu.memref_slice %arg6[%9, %c0_i32_41, %c0_i32_42] : memref<2x4x384xbf16, #tpu.memory_space<vmem>> -> memref<1x4x384xbf16, #tpu.memory_space<vmem>>
    %55 = tpu.memref_squeeze %54 : memref<1x4x384xbf16, #tpu.memory_space<vmem>> -> memref<4x384xbf16, #tpu.memory_space<vmem>>
    %c0_43 = arith.constant 0 : index
    %c19 = arith.constant 19 : index
    %56 = vector.load %55[%c0_43, %c19] : memref<4x384xbf16, #tpu.memory_space<vmem>>, vector<4x256xbf16>
    %cst_44 = arith.constant dense<0.000000e+00> : vector<8x256xf32>
    %57 = tpu.matmul %53, %56, %cst_44 {dimension_numbers = #tpu.dot_dimension_numbers<[1], [0], [0], [1], [0, 0, 1, 1], [], []>} : vector<8x4xbf16>, vector<4x256xbf16>, vector<8x256xf32> -> vector<8x256xf32>
    %58 = arith.addf %51, %57 : vector<8x256xf32>
    %c5 = arith.constant 5 : index
    %c0_45 = arith.constant 0 : index
    %c0_46 = arith.constant 0 : index
    %59 = vector.load %arg3[%c5, %c0_45, %c0_46] : memref<9x8x4xbf16, #tpu.memory_space<vmem>>, vector<1x8x4xbf16>
    %60 = vector.shape_cast %59 : vector<1x8x4xbf16> to vector<8x4xbf16>
    %c0_i32_47 = arith.constant 0 : i32
    %c0_i32_48 = arith.constant 0 : i32
    %61 = tpu.memref_slice %arg6[%9, %c0_i32_47, %c0_i32_48] : memref<2x4x384xbf16, #tpu.memory_space<vmem>> -> memref<1x4x384xbf16, #tpu.memory_space<vmem>>
    %62 = tpu.memref_squeeze %61 : memref<1x4x384xbf16, #tpu.memory_space<vmem>> -> memref<4x384xbf16, #tpu.memory_space<vmem>>
    %c0_49 = arith.constant 0 : index
    %c20 = arith.constant 20 : index
    %63 = vector.load %62[%c0_49, %c20] : memref<4x384xbf16, #tpu.memory_space<vmem>>, vector<4x256xbf16>
    %cst_50 = arith.constant dense<0.000000e+00> : vector<8x256xf32>
    %64 = tpu.matmul %60, %63, %cst_50 {dimension_numbers = #tpu.dot_dimension_numbers<[1], [0], [0], [1], [0, 0, 1, 1], [], []>} : vector<8x4xbf16>, vector<4x256xbf16>, vector<8x256xf32> -> vector<8x256xf32>
    %65 = arith.addf %58, %64 : vector<8x256xf32>
    %c6 = arith.constant 6 : index
    %c0_51 = arith.constant 0 : index
    %c0_52 = arith.constant 0 : index
    %66 = vector.load %arg3[%c6, %c0_51, %c0_52] : memref<9x8x4xbf16, #tpu.memory_space<vmem>>, vector<1x8x4xbf16>
    %67 = vector.shape_cast %66 : vector<1x8x4xbf16> to vector<8x4xbf16>
    %c0_i32_53 = arith.constant 0 : i32
    %c0_i32_54 = arith.constant 0 : i32
    %68 = tpu.memref_slice %arg6[%9, %c0_i32_53, %c0_i32_54] : memref<2x4x384xbf16, #tpu.memory_space<vmem>> -> memref<1x4x384xbf16, #tpu.memory_space<vmem>>
    %69 = tpu.memref_squeeze %68 : memref<1x4x384xbf16, #tpu.memory_space<vmem>> -> memref<4x384xbf16, #tpu.memory_space<vmem>>
    %c0_55 = arith.constant 0 : index
    %c36 = arith.constant 36 : index
    %70 = vector.load %69[%c0_55, %c36] : memref<4x384xbf16, #tpu.memory_space<vmem>>, vector<4x256xbf16>
    %cst_56 = arith.constant dense<0.000000e+00> : vector<8x256xf32>
    %71 = tpu.matmul %67, %70, %cst_56 {dimension_numbers = #tpu.dot_dimension_numbers<[1], [0], [0], [1], [0, 0, 1, 1], [], []>} : vector<8x4xbf16>, vector<4x256xbf16>, vector<8x256xf32> -> vector<8x256xf32>
    %72 = arith.addf %65, %71 : vector<8x256xf32>
    %c7 = arith.constant 7 : index
    %c0_57 = arith.constant 0 : index
    %c0_58 = arith.constant 0 : index
    %73 = vector.load %arg3[%c7, %c0_57, %c0_58] : memref<9x8x4xbf16, #tpu.memory_space<vmem>>, vector<1x8x4xbf16>
    %74 = vector.shape_cast %73 : vector<1x8x4xbf16> to vector<8x4xbf16>
    %c0_i32_59 = arith.constant 0 : i32
    %c0_i32_60 = arith.constant 0 : i32
    %75 = tpu.memref_slice %arg6[%9, %c0_i32_59, %c0_i32_60] : memref<2x4x384xbf16, #tpu.memory_space<vmem>> -> memref<1x4x384xbf16, #tpu.memory_space<vmem>>
    %76 = tpu.memref_squeeze %75 : memref<1x4x384xbf16, #tpu.memory_space<vmem>> -> memref<4x384xbf16, #tpu.memory_space<vmem>>
    %c0_61 = arith.constant 0 : index
    %c37 = arith.constant 37 : index
    %77 = vector.load %76[%c0_61, %c37] : memref<4x384xbf16, #tpu.memory_space<vmem>>, vector<4x256xbf16>
    %cst_62 = arith.constant dense<0.000000e+00> : vector<8x256xf32>
    %78 = tpu.matmul %74, %77, %cst_62 {dimension_numbers = #tpu.dot_dimension_numbers<[1], [0], [0], [1], [0, 0, 1, 1], [], []>} : vector<8x4xbf16>, vector<4x256xbf16>, vector<8x256xf32> -> vector<8x256xf32>
    %79 = arith.addf %72, %78 : vector<8x256xf32>
    %c8 = arith.constant 8 : index
    %c0_63 = arith.constant 0 : index
    %c0_64 = arith.constant 0 : index
    %80 = vector.load %arg3[%c8, %c0_63, %c0_64] : memref<9x8x4xbf16, #tpu.memory_space<vmem>>, vector<1x8x4xbf16>
    %81 = vector.shape_cast %80 : vector<1x8x4xbf16> to vector<8x4xbf16>
    %c0_i32_65 = arith.constant 0 : i32
    %c0_i32_66 = arith.constant 0 : i32
    %82 = tpu.memref_slice %arg6[%9, %c0_i32_65, %c0_i32_66] : memref<2x4x384xbf16, #tpu.memory_space<vmem>> -> memref<1x4x384xbf16, #tpu.memory_space<vmem>>
    %83 = tpu.memref_squeeze %82 : memref<1x4x384xbf16, #tpu.memory_space<vmem>> -> memref<4x384xbf16, #tpu.memory_space<vmem>>
    %c0_67 = arith.constant 0 : index
    %c38 = arith.constant 38 : index
    %84 = vector.load %83[%c0_67, %c38] : memref<4x384xbf16, #tpu.memory_space<vmem>>, vector<4x256xbf16>
    %cst_68 = arith.constant dense<0.000000e+00> : vector<8x256xf32>
    %85 = tpu.matmul %81, %84, %cst_68 {dimension_numbers = #tpu.dot_dimension_numbers<[1], [0], [0], [1], [0, 0, 1, 1], [], []>} : vector<8x4xbf16>, vector<4x256xbf16>, vector<8x256xf32> -> vector<8x256xf32>
    %86 = arith.addf %79, %85 : vector<8x256xf32>
    %c0_69 = arith.constant 0 : index
    %c0_70 = arith.constant 0 : index
    %87 = vector.load %arg4[%c0_69, %c0_70] : memref<8x1xf32, #tpu.memory_space<vmem>>, vector<8x1xf32>
    %88 = vector.broadcast %87 : vector<8x1xf32> to vector<8x256xf32>
    %89 = arith.addf %86, %88 : vector<8x256xf32>
    %cst_71 = arith.constant 0.000000e+00 : f32
    %90 = vector.broadcast %cst_71 : f32 to vector<8x256xf32>
    %91 = arith.subf %90, %89 : vector<8x256xf32>
    %92 = math.exp %91 : vector<8x256xf32>
    %cst_72 = arith.constant 1.000000e+00 : f32
    %93 = vector.broadcast %cst_72 : f32 to vector<8x256xf32>
    %94 = arith.addf %93, %92 : vector<8x256xf32>
    %95 = tpu.reciprocal %94 {approx = true} : vector<8x256xf32> -> vector<8x256xf32>
    %96 = arith.mulf %89, %95 : vector<8x256xf32>
    %97 = arith.truncf %96 : vector<8x256xf32> to vector<8x256xbf16>
    %c0_73 = arith.constant 0 : index
    %c0_74 = arith.constant 0 : index
    %c0_75 = arith.constant 0 : index
    %98 = vector.load %arg5[%c0_73, %c0_74, %c0_75] : memref<1x8x256xbf16, #tpu.memory_space<vmem>>, vector<1x8x256xbf16>
    %99 = vector.shape_cast %98 : vector<1x8x256xbf16> to vector<8x256xbf16>
    %100 = vector.shape_cast %97 : vector<8x256xbf16> to vector<1x8x256xbf16>
    tpu.vector_store %arg5[%c0_73, %c0_74, %c0_75], %100 {strides = array<i32>} : memref<1x8x256xbf16, #tpu.memory_space<vmem>>, vector<1x8x256xbf16>,
    return
  }
  func.func @transform_1(%arg0: i32, %arg1: i32) -> (i32, i32, i32) {
    %c0_i32 = arith.constant 0 : i32
    %c0_i32_0 = arith.constant 0 : i32
    %c0_i32_1 = arith.constant 0 : i32
    %c0_i32_2 = arith.constant 0 : i32
    return %c0_i32, %c0_i32_0, %c0_i32_1 : i32, i32, i32
  }
  func.func @transform_2(%arg0: i32, %arg1: i32) -> (i32, i32) {
    %c0_i32 = arith.constant 0 : i32
    %c0_i32_0 = arith.constant 0 : i32
    %c0_i32_1 = arith.constant 0 : i32
    return %c0_i32, %c0_i32_0 : i32, i32
  }
  func.func @transform_3(%arg0: i32, %arg1: i32) -> (i32, i32, i32) {
    %c0_i32 = arith.constant 0 : i32
    %c0_i32_0 = arith.constant 0 : i32
    return %arg0, %c0_i32, %arg1 : i32, i32, i32
  }
}

</mosaic_0001>

<bundles_post_ra>
// kernel: tpu_custom_call.1
= control target key start
LH: loop header
LB: loop body
LE: loop exit
PB: predicated region body
PF: predicated region fallthrough
CT: control target
= control target key end

     0   :  { %8 = vsyncpa [#allocation5], 0  ;;  %s1687_s0 = inlined_call_operand.vmem [shape: bf16[2,4,648], index: 0, kind: input, shape index: {}]   ;;  %s1688_s1 = inlined_call_operand.vmem [shape: bf16[9,8,4], index: 1, kind: input, shape index: {}]   ;;  %s1689_s2 = inlined_call_operand.vmem [shape: f32[8,1], index: 2, kind: input, shape index: {}]   ;;  %s1690_s3 = inlined_call_operand.hbm [shape: bf16[2,8,288], index: 3, kind: output, shape index: {}]  }
   0x1   :  { %10 = vsyncpa [#allocation5 + $0x1], 0  ;;  %s1431_s12 = smov 0   ;;  %s1433_s13 = smov 0  }
   0x2   :  { %s1435_s14 = smov 0   ;;  %s1437_s15 = smov 0  }
   0x3   :  { %s1439_s16 = smov 0   ;;  %s1441_s17 = smov 0  }
   0x4   :  { %s1443_s18 = smov 0   ;;  %s1445_s19 = smov 0  }
   0x5 LB: > { %s1146_s20 = sadd.s32 4294967295, %s1398_s19   ;;  %s1147_s21 = sadd.s32 4294967294, %s1398_s19   ;;  %s1398_s19 = sphi %s1445_s19, %s16_s19   ;;  %s1394_s18 = sphi %s1443_s18, %s1709_s18   ;;  %s1390_s17 = sphi %s1441_s17, %s1708_s17   ;;  %s1386_s16 = sphi %s1439_s16, %s1707_s16   ;;  %s1382_s15 = sphi %s1437_s15, %s1706_s15   ;;  %s1378_s14 = sphi %s1435_s14, %s1705_s14   ;;  %s1374_s13 = sphi %s1433_s13, %s1704_s13   ;;  %s1370_s12 = sphi %s1431_s12, %s1703_s12  }
   0x6   : > { %s25_s22 = sadd.s32 1, %s1390_s17  ;;  %s28_s23 = sadd.s32 1, %s1394_s18 }
   0x7   : > { %p26_p0 = scmp.ge.s32.totalorder %s25_s22, 2  ;;  %p89_p1 = scmp.ne.s32.totalorder %s1378_s14, %s1374_s13 }
   0x8   : > { %p90_p2 = scmp.eq.s32.totalorder %s1146_s20, 3  ;;  %p95_p5 = scmp.ne.s32.totalorder %s1374_s13, %s1370_s12 }
   0x9   : > { %s1711_s22 = smov (%p26_p0, %s25_s22), 0  ;;  %s1713_s23 = smov (!%p26_p0, %s28_s23), %s1394_s18 }
   0xa   : > { %1694 = sst [smem:[#allocation10_spill]] %s1711_s22  ;;  %s75_s24 = ssub.s32 %s1390_s17, %s1711_s22 }
   0xb   : > { %p1482_p3 = por %p90_p2, %p89_p1  ;;  %p30_p4 = scmp.ge.s32.totalorder %s1713_s23, 2 }
   0xc   : > { %p96_p6 = scmp.eq.s32.totalorder %s1147_s21, 3  ;;  %p1149_p7 = scmp.ge.s32.totalorder %s1398_s19, 1 }
   0xd   : > { %s1715_s23 = smov (%p30_p4, %s1713_s23), 0  ;;  %p120_p9 = scmp.lt.s32.totalorder %s1398_s19, 5 }
   0xe   : > { %1696 = sst [smem:[#allocation11_spill]] %s1715_s23  ;;  %p1491_p8 = por %p96_p6, %p95_p5 }
   0xf   : > { %s74_s27 = ssub.s32 %s1394_s18, %s1715_s23  ;;  %s79_s28 = sadd.s32 1, %s1378_s14 }
  0x10   : > { %s76_s29 = sor.u32 %s75_s24, %s74_s27  ;;  %p121_p10 = pnand %p1149_p7, %p120_p9 }
  0x11   : > { %p77_p11 = scmp.eq.s32.totalorder %s76_s29, 0  ;;  %s1691_s4 = sand.u32 (!%p121_p10), 1, %s1374_s13  }
  0x12   : > { %124 = sbr.rel (%p121_p10) target bundleno = 487 (0x1e7), region = 28  ;;  %p143_p12 = scmp.lt.s32.totalorder (!%p121_p10), %s1382_s15, 0 }
  0x13   : > { %s1500_s30 = scalar_select %p77_p11, %s1378_s14, %s79_s28  }
  0x14   : > { %s1506_s5 = sshll.u32 (!%p121_p10), %s1691_s4, 3  ;;  %s144_s6 = ssub.s32 (!%p121_p10), 0, %s1382_s15 }
  0x15   : > { %s1151_s7 = smin.u32 (!%p121_p10), %s1382_s15, %s144_s6  ;;  %p1154_p0 = scmp.ne.s32.totalorder (!%p121_p10), %s1382_s15, 0 }
  0x16   : > { %s146_s8 = sand.u32 (!%p121_p10), 1, %s1151_s7  }
  0x17   : > { %s147_s9 = ssub.s32 0, %s146_s8  ;;  %158 = sbr.rel (%p1154_p0) target bundleno = 31 (0x1f), region = 32 }
  0x18   : > { %s1717_s9 = smov (!%p143_p12, %s147_s9), %s146_s8  ;;  %s1200_s20 = smul.u32 (!%p1154_p0), 12, %s1386_s16 }
  0x19   : > { %p1153_p13 = scmp.lt.s32.totalorder %s1717_s9, 0  ;;  %s153_s10 = sadd.s32 2, %s1717_s9 }
  0x1a   : > { %s161_s27 = scalar_lea.vmem (!%p1154_p0), %s1687_s0, %s1200_s20 }
  0x1b   : > { %s1719_s10 = smov (!%p1153_p13, %s153_s10), %s1717_s9 }
  0x1c   : > { %v180_v0 = vld [vmem:[%s161_s27] sm:$0x3f] }
  0x1d   : > { %181 = vst [vmem:[#allocation2] sm:$0x3f] %v180_v0 }
  0x1e   : > { %207 = vsyncadd [#allocation3], 96 }
  0x1f PF: > { %s1201_s28 = smul.u32 6, %s1719_s10  ;;  %s211_s6 = scalar_lea.sflag [#allocation3], %s1719_s10 }
  0x21   : > { %s1519_s29 = scalar_lea.vmem [#allocation2], %s1201_s28 }
  0x22   : > { %1362 = dma.done.wait %s211_s6, 96 }
  0x23   : > { %1363 = vsyncadd %s211_s6, 4294967200  ;;  %s216_s7 = sadd.s32 1, %s1382_s15 }
  0x24   : > { %p1157_p1 = scmp.ge.s32.totalorder %s216_s7, 2 }
  0x25   : > { %s221_s8 = ssub.s32 (!%p1157_p1), 1, %s1719_s10  ;;  %s1202_s9 = sshll.u32 (!%p1157_p1), %s1382_s15, 8 }
  0x26   : > { %220 = sbr.rel (%p1157_p1) target bundleno = 47 (0x2f), region = 66  ;;  %s1203_s20 = sadd.s32 (!%p1157_p1), 256, %s1202_s9 }
  0x27   : > { %s225_s21 = smul.u32 (!%p1157_p1), 6, %s1386_s16  ;;  %s223_s24 = sshra.s32 (!%p1157_p1), %s1203_s20, 7 }
  0x28   : > { %s1204_s27 = smul.u32 (!%p1157_p1), 6, %s221_s8  ;;  %s232_s7 = scalar_lea.sflag (!%p1157_p1), [#allocation3], %s221_s8 }
  0x29   : > { %s226_s4 = sadd.s32 (!%p1157_p1), %s225_s21, %s223_s24 }
  0x2a   : > { %s1159_s11 = sshll.u32 (!%p1157_p1), %s226_s4, 1  ;;  %s231_s6 = scalar_lea.vmem (!%p1157_p1), [#allocation2], %s1204_s27 }
  0x2b   : > { %s228_s22 = scalar_lea.vmem %s1687_s0, %s1159_s11 }
  0x2c   : > { %v251_v1 = vld [vmem:[%s228_s22] sm:$0x3f] }
  0x2d   : > { %252 = vst [vmem:[%s231_s6] sm:$0x3f] %v251_v1 }
  0x2e   : > { %278 = vsyncadd %s232_s7, 96 }
  0x2f PF: > { %v289_v3 = vlaneseq  ;;  %v1400_v4 = vmov 1983009808   ;;  %v1401_v11 = vmov 0   ;;  %s1402_s22 = smov 127   ;;  %vm314_vm0 = vcmask 1041408   ;;  %s1403_s23 = smov 126  }
  0x30   : > { %v287_v5 = vunpack.c.l.s4 %v1400_v4  ;;  %353 = vmatprep.mubr.bf16.mxu0 %v1401_v11  ;;  %412 = vmatprep.mubr.bf16.mxu1 %v1401_v11  ;;  %v279_v24 = vld [vmem:[%s1688_s1] sm:$0xf]  ;;  %vm310_vm1 = vcmask 31744   ;;  %s1404_s11 = smov 110   ;;  %s1405_s8 = smov 109   ;;  %vm307_vm2 = vcmask 1039360  }
  0x31   : > { %v290_v6 = vshrl.u32 %v289_v3, 7  ;;  %1287 = vset.pattern.permute.xlu0 %v1401_v11  ;;  %s1406_s9 = smov 108   ;;  %s1407_s20 = smov 92   ;;  %v988_v53 = vld [vmem:[%s1689_s2] sm:$0xff]  ;;  %vm447_vm3 = vcmask 1031168   ;;  %vm528_vm4 = vcmask 900096  }
  0x32   : > { %v288_v7 = vunpack.c.0.s8 %v287_v5  ;;  %s1408_s21 = smov 91   ;;  %s1409_s24 = smov 90   ;;  %v1161_v61 = vld [vmem:[%s1688_s1 + $0x4] sm:$0xf]  ;;  %vm609_vm5 = vcmask 891904   ;;  %vm690_vm6 = vcmask 883712  }
  0x33   : > { %vm771_vm7 = vcmask 752640   ;;  %vm852_vm8 = vcmask 744448   ;;  %vm933_vm9 = vcmask 736256   ;;  %s1698_s6 = scalar_lea.vmem [#allocation4], %s1506_s5  ;;  %s1699_s7 = sand.u32 1, %s1374_s13  }
  0x34   : > { %v283_v2 = vld [vmem:[%s1519_s29] sm:$0x3f]  ;;  %v1530_v9 = vsub.s32 %v288_v7, %v290_v6 }
  0x35   : > { %v285_v8 = vcombine.high %v283_v2, %v283_v2  ;;  %v423_v10 = vld [vmem:[%s1519_s29] sm:$0x3f] }
  0x36   : > { %v292_v12 = vrot.slane %v283_v2, %v1530_v9  ;;  %v432_v15 = vrot.slane %v423_v10, %v1530_v9  ;;  %v425_v16 = vcombine.high %v423_v10, %v423_v10  ;;  %v1164_v17 = vld.sshfl [vmem:[%s1519_s29] sm:$0x33 pattern:$0x76325410] }
  0x37   : > { %v299_v13 = vrot.slane %v285_v8, %v1530_v9  ;;  %v504_v18 = vld [vmem:[%s1519_s29] sm:$0x3f]  ;;  %v370_v19 = vcombine.high %v1164_v17, %v1164_v17  ;;  %v375_v23 = vsel %vm314_vm0, %v1164_v17, 0 }
  0x38   : > { %301 = vrot.lane.b32.xlu0 %v292_v12, %s1402_s22  ;;  %v300_v14 = vcombine.high %v292_v12, %v292_v12  ;;  %v440_v20 = vcombine.high %v432_v15, %v432_v15  ;;  %v439_v21 = vrot.slane %v425_v16, %v1530_v9  ;;  %v513_v22 = vrot.slane %v504_v18, %v1530_v9  ;;  %v585_v27 = vld [vmem:[%s1519_s29] sm:$0x3f]  ;;  %v1170_v12 = vld [vmem:[%s1688_s1 + $0xc] sm:$0xf] }
  0x39   : > { %305 = vrot.lane.b32.xlu1 %v299_v13, %s1402_s22  ;;  %1165 = vmatprep.subr.msk.bf16.mxu1 %vm314_vm0, %v370_v19  ;;  %v506_v26 = vcombine.high %v504_v18, %v504_v18  ;;  %v594_v29 = vrot.slane %v585_v27, %v1530_v9  ;;  %v587_v30 = vcombine.high %v585_v27, %v585_v27  ;;  %v666_v31 = vld [vmem:[%s1519_s29] sm:$0x3f]  ;;  %v1173_v18 = vld [vmem:[%s1688_s1 + $0x10] sm:$0xf] }
  0x3a   : > { %395 = vmatpush1.bf16.msra.mxu1 %v375_v23  ;;  %v521_v25 = vcombine.high %v513_v22, %v513_v22  ;;  %v675_v34 = vrot.slane %v666_v31, %v1530_v9  ;;  %v668_v36 = vcombine.high %v666_v31, %v666_v31  ;;  %v747_v37 = vld [vmem:[%s1519_s29] sm:$0x3f] }
  0x3b   : > { %v520_v28 = vrot.slane %v506_v26, %v1530_v9  ;;  %v602_v32 = vcombine.high %v594_v29, %v594_v29  ;;  %v601_v33 = vrot.slane %v587_v30, %v1530_v9  ;;  %v756_v39 = vrot.slane %v747_v37, %v1530_v9  ;;  %v828_v41 = vld [vmem:[%s1519_s29] sm:$0x3f]  ;;  %v1176_v26 = vld [vmem:[%s1688_s1 + $0x14] sm:$0xf] }
  0x3c   : > { %303 = vrot.lane.b32.xlu0 %v300_v14, %s1402_s22  ;;  %v683_v35 = vcombine.high %v675_v34, %v675_v34  ;;  %v682_v38 = vrot.slane %v668_v36, %v1530_v9  ;;  %v749_v40 = vcombine.high %v747_v37, %v747_v37  ;;  %v837_v44 = vrot.slane %v828_v41, %v1530_v9  ;;  %v909_v47 = vld [vmem:[%s1519_s29] sm:$0x3f]  ;;  %s1627_s22 = scalar_lea.sflag [#allocation5], %s1699_s7 }
  0x3d   : > { %441 = vrot.lane.b32.xlu1 %v432_v15, %s1403_s23  ;;  %1166 = vmatmul.mubr.msk.bf16.vlgmr.msra.gmra.mxu1 %vm310_vm1, %v279_v24  ;;  %v764_v42 = vcombine.high %v756_v39, %v756_v39  ;;  %v830_v46 = vcombine.high %v828_v41, %v828_v41  ;;  %v918_v49 = vrot.slane %v909_v47, %v1530_v9  ;;  %v1167_v6 = vld [vmem:[%s1688_s1 + $0x8] sm:$0xf] }
  0x3e   : > { %572 = vmatprep.mubr.bf16.mxu1 %v1401_v11  ;;  %v763_v43 = vrot.slane %v749_v40, %v1530_v9  ;;  %v845_v45 = vcombine.high %v837_v44, %v837_v44  ;;  %v911_v50 = vcombine.high %v909_v47, %v909_v47  ;;  %v1182_v40 = vld [vmem:[%s1688_s1 + $0x1c] sm:$0xf] }
  0x3f   : > { %v844_v48 = vrot.slane %v830_v46, %v1530_v9  ;;  %v926_v51 = vcombine.high %v918_v49, %v918_v49 }
  0x40   : > { %443 = vrot.lane.b32.xlu0 %v440_v20, %s1403_s23  ;;  %v925_v52 = vrot.slane %v911_v50, %v1530_v9 }
  0x41   : > { %445 = vrot.lane.b32.xlu1 %v439_v21, %s1403_s23  ;;  %s1190_s23 = sshll.u32 (%p1482_p3), %s1382_s15, 1 }
  0x42   : > { %s1026_s4 = ssub.s32 (%p1482_p3), 3, %s1190_s23 }
  0x43   : > { %p1027_p2 = scmp.lt.s32.totalorder (%p1482_p3), %s1026_s4, 2 }
  0x44   : > { %522 = vrot.lane.b32.xlu0 %v513_v22, %s1404_s11 }
  0x45   : > { %524 = vrot.lane.b32.xlu1 %v521_v25, %s1404_s11 }
  0x48   : > { %526 = vrot.lane.b32.xlu0 %v520_v28, %s1404_s11 }
  0x49   : > { %603 = vrot.lane.b32.xlu1 %v594_v29, %s1405_s8 }
  0x4c   : > { %605 = vrot.lane.b32.xlu0 %v602_v32, %s1405_s8  ;;  %v1179_v32 = vld [vmem:[%s1688_s1 + $0x18] sm:$0xf] }
  0x4d   : > { %607 = vrot.lane.b32.xlu1 %v601_v33, %s1405_s8 }
  0x50   : > { %684 = vrot.lane.b32.xlu0 %v675_v34, %s1406_s9 }
  0x51   : > { %686 = vrot.lane.b32.xlu1 %v683_v35, %s1406_s9 }
  0x54   : > { %688 = vrot.lane.b32.xlu0 %v682_v38, %s1406_s9 }
  0x55   : > { %765 = vrot.lane.b32.xlu1 %v756_v39, %s1407_s20 }
  0x58   : > { %767 = vrot.lane.b32.xlu0 %v764_v42, %s1407_s20 }
  0x59   : > { %769 = vrot.lane.b32.xlu1 %v763_v43, %s1407_s20 }
  0x5c   : > { %846 = vrot.lane.b32.xlu0 %v837_v44, %s1408_s21 }
  0x5d   : > { %848 = vrot.lane.b32.xlu1 %v845_v45, %s1408_s21 }
  0x60   : > { %850 = vrot.lane.b32.xlu0 %v844_v48, %s1408_s21 }
  0x61   : > { %927 = vrot.lane.b32.xlu1 %v918_v49, %s1409_s24 }
  0x64   : > { %929 = vrot.lane.b32.xlu0 %v926_v51, %s1409_s24 }
  0x65   : > { %931 = vrot.lane.b32.xlu1 %v925_v52, %s1409_s24 }
  0x68   : > { %991 = vperm.xlu0 %1287, %v988_v53  }
  0xaa   : > { %v302_v54 = vpop.permute.xlu0 %301 }
  0xab   : > { %v306_v55 = vpop.permute.xlu1 %305 }
  0xae   : > { %v304_v56 = vpop.permute.xlu0 %303 }
  0xaf   : > { %v442_v57 = vpop.permute.xlu1 %441  ;;  %v309_v58 = vsel %vm307_vm2, %v304_v56, %v306_v55  ;;  %v308_v59 = vsel %vm307_vm2, %v302_v54, %v304_v56 }
  0xb0   : > { %1162 = vmatprep.subr.msk.bf16.mxu0 %vm314_vm0, %v309_v58  ;;  %v316_v60 = vsel %vm314_vm0, %v308_v59, 0 }
  0xb1   : > { %336 = vmatpush1.bf16.msra.mxu0 %v316_v60 }
  0xb2   : > { %v444_v62 = vpop.permute.xlu0 %443 }
  0xb3   : > { %v446_v63 = vpop.permute.xlu1 %445  ;;  %v448_v0 = vsel %vm447_vm3, %v442_v57, %v444_v62 }
  0xb4   : > { %v449_v1 = vsel %vm447_vm3, %v444_v62, %v446_v63  ;;  %v454_v2 = vsel %vm314_vm0, %v448_v0, 0  ;;  %1163 = vmatmul.mubr.msk.bf16.vlgmr.msra.gmra.mxu0 %vm310_vm1, %v1161_v61 }
  0xb5   : > { %1168 = vmatprep.subr.msk.bf16.mxu0 %vm314_vm0, %v449_v1  ;;  %491 = vmatprep.mubr.bf16.mxu0 %v1401_v11 }
  0xb6   : > { %474 = vmatpush1.bf16.msra.mxu0 %v454_v2  ;;  %v523_v3 = vpop.permute.xlu0 %522 }
  0xb7   : > { %v525_v4 = vpop.permute.xlu1 %524 }
  0xb8   : > { %v529_v5 = vsel %vm528_vm4, %v523_v3, %v525_v4 }
  0xb9   : > { %v535_v10 = vsel %vm314_vm0, %v529_v5, 0 }
  0xba   : > { %v527_v7 = vpop.permute.xlu0 %526 }
  0xbb   : > { %v604_v8 = vpop.permute.xlu1 %603  ;;  %v530_v9 = vsel %vm528_vm4, %v525_v4, %v527_v7 }
  0xbc   : > { %1171 = vmatprep.subr.msk.bf16.mxu1 %vm314_vm0, %v530_v9  ;;  %1169 = vmatmul.mubr.msk.bf16.vlgmr.msra.gmra.mxu0 %vm310_vm1, %v1167_v6 }
  0xbd   : > { %555 = vmatpush1.bf16.msra.mxu1 %v535_v10  ;;  %653 = vmatprep.mubr.bf16.mxu0 %v1401_v11 }
  0xbe   : > { %v606_v13 = vpop.permute.xlu0 %605 }
  0xbf   : > { %v608_v14 = vpop.permute.xlu1 %607  ;;  %v610_v15 = vsel %vm609_vm5, %v604_v8, %v606_v13 }
  0xc0   : > { %v611_v16 = vsel %vm609_vm5, %v606_v13, %v608_v14  ;;  %v616_v17 = vsel %vm314_vm0, %v610_v15, 0  ;;  %1172 = vmatmul.mubr.msk.bf16.vlgmr.msra.gmra.mxu1 %vm310_vm1, %v1170_v12 }
  0xc1   : > { %1174 = vmatprep.subr.msk.bf16.mxu0 %vm314_vm0, %v611_v16  ;;  %734 = vmatprep.mubr.bf16.mxu1 %v1401_v11 }
  0xc2   : > { %636 = vmatpush1.bf16.msra.mxu0 %v616_v17  ;;  %v685_v19 = vpop.permute.xlu0 %684 }
  0xc3   : > { %v687_v20 = vpop.permute.xlu1 %686 }
  0xc4   : > { %v691_v21 = vsel %vm690_vm6, %v685_v19, %v687_v20 }
  0xc5   : > { %1175 = vmatmul.mubr.msk.bf16.vlgmr.msra.gmra.mxu0 %vm310_vm1, %v1173_v18  ;;  %v697_v25 = vsel %vm314_vm0, %v691_v21, 0 }
  0xc6   : > { %815 = vmatprep.mubr.bf16.mxu0 %v1401_v11  ;;  %v689_v22 = vpop.permute.xlu0 %688 }
  0xc7   : > { %v766_v23 = vpop.permute.xlu1 %765  ;;  %v692_v24 = vsel %vm690_vm6, %v687_v20, %v689_v22 }
  0xc8   : > { %1177 = vmatprep.subr.msk.bf16.mxu1 %vm314_vm0, %v692_v24 }
  0xc9   : > { %717 = vmatpush1.bf16.msra.mxu1 %v697_v25 }
  0xca   : > { %v768_v27 = vpop.permute.xlu0 %767 }
  0xcb   : > { %v770_v28 = vpop.permute.xlu1 %769  ;;  %v772_v29 = vsel %vm771_vm7, %v766_v23, %v768_v27 }
  0xcc   : > { %v773_v30 = vsel %vm771_vm7, %v768_v27, %v770_v28  ;;  %v778_v31 = vsel %vm314_vm0, %v772_v29, 0  ;;  %1178 = vmatmul.mubr.msk.bf16.vlgmr.msra.gmra.mxu1 %vm310_vm1, %v1176_v26 }
  0xcd   : > { %1180 = vmatprep.subr.msk.bf16.mxu0 %vm314_vm0, %v773_v30  ;;  %896 = vmatprep.mubr.bf16.mxu1 %v1401_v11 }
  0xce   : > { %798 = vmatpush1.bf16.msra.mxu0 %v778_v31  ;;  %v847_v33 = vpop.permute.xlu0 %846 }
  0xcf   : > { %v849_v34 = vpop.permute.xlu1 %848 }
  0xd0   : > { %v853_v35 = vsel %vm852_vm8, %v847_v33, %v849_v34 }
  0xd1   : > { %1181 = vmatmul.mubr.msk.bf16.vlgmr.msra.gmra.mxu0 %vm310_vm1, %v1179_v32  ;;  %v859_v39 = vsel %vm314_vm0, %v853_v35, 0 }
  0xd2   : > { %977 = vmatprep.mubr.bf16.mxu0 %v1401_v11  ;;  %v851_v36 = vpop.permute.xlu0 %850  ;;  %v1185_v11 = vld [vmem:[%s1688_s1 + $0x20] sm:$0xf] }
  0xd3   : > { %v928_v37 = vpop.permute.xlu1 %927  ;;  %v854_v38 = vsel %vm852_vm8, %v849_v34, %v851_v36 }
  0xd4   : > { %1183 = vmatprep.subr.msk.bf16.mxu1 %vm314_vm0, %v854_v38 }
  0xd5   : > { %879 = vmatpush1.bf16.msra.mxu1 %v859_v39 }
  0xd6   : > { %v930_v41 = vpop.permute.xlu0 %929 }
  0xd7   : > { %v932_v42 = vpop.permute.xlu1 %931  ;;  %v934_v43 = vsel %vm933_vm9, %v928_v37, %v930_v41 }
  0xd8   : > { %v935_v44 = vsel %vm933_vm9, %v930_v41, %v932_v42  ;;  %v940_v45 = vsel %vm314_vm0, %v934_v43, 0  ;;  %1184 = vmatmul.mubr.msk.bf16.vlgmr.msra.gmra.mxu1 %vm310_vm1, %v1182_v40 }
  0xd9   : > { %1186 = vmatprep.subr.msk.bf16.mxu0 %vm314_vm0, %v935_v44 }
  0xda   : > { %960 = vmatpush1.bf16.msra.mxu0 %v940_v45 }
  0xdd   : > { %1187 = vmatmul.mubr.msk.bf16.vlgmr.msra.gmra.mxu0 %vm310_vm1, %v1185_v11 }
  0xe3   : > { %v992_v26 = vpop.permute.xlu0 %991 }
  0xfd   : > { %v414_v46 = vpop.f32.mrf.mxu1 }
  0xff   : > { %v416_v47 = vpop.f32.mrf.mxu1 }
 0x101   : > { %v418_v48 = vpop.f32.mrf.mxu1 }
 0x103   : > { %v419_v49 = vpop.f32.mrf.mxu1 }
 0x174   : > { %v355_v50 = vpop.f32.mrf.mxu0 }
 0x175   : > { %v415_v2 = vadd.f32 %v414_v46, %v355_v50 }
 0x176   : > { %v357_v51 = vpop.f32.mrf.mxu0 }
 0x177   : > { %v417_v5 = vadd.f32 %v416_v47, %v357_v51 }
 0x178   : > { %v359_v52 = vpop.f32.mrf.mxu0 }
 0x17a   : > { %v360_v53 = vpop.f32.mrf.mxu0 }
 0x17c   : > { %v493_v54 = vpop.f32.mrf.mxu0 }
 0x17d   : > { %v500_v6 = vadd.f32 %v493_v54, %v415_v2 }
 0x17e   : > { %v495_v55 = vpop.f32.mrf.mxu0 }
 0x17f   : > { %v501_v12 = vadd.f32 %v495_v55, %v417_v5 }
 0x180   : > { %v497_v56 = vpop.f32.mrf.mxu0  ;;  %v574_v57 = vpop.f32.mrf.mxu1 }
 0x181   : > { %v581_v13 = vadd.f32 %v574_v57, %v500_v6 }
 0x182   : > { %v498_v58 = vpop.f32.mrf.mxu0  ;;  %v576_v59 = vpop.f32.mrf.mxu1 }
 0x183   : > { %v582_v15 = vadd.f32 %v576_v59, %v501_v12 }
 0x184   : > { %v578_v61 = vpop.f32.mrf.mxu1 }
 0x185   : > { %v655_v60 = vpop.f32.mrf.mxu0 }
 0x186   : > { %v579_v63 = vpop.f32.mrf.mxu1  ;;  %v662_v16 = vadd.f32 %v655_v60, %v581_v13 }
 0x187   : > { %v657_v62 = vpop.f32.mrf.mxu0 }
 0x188   : > { %v663_v18 = vadd.f32 %v657_v62, %v582_v15 }
 0x189   : > { %v659_v0 = vpop.f32.mrf.mxu0 }
 0x18b   : > { %v660_v1 = vpop.f32.mrf.mxu0 }
 0x18c   : > { %v736_v3 = vpop.f32.mrf.mxu1 }
 0x18d   : > { %v743_v19 = vadd.f32 %v736_v3, %v662_v16 }
 0x18e   : > { %v738_v4 = vpop.f32.mrf.mxu1 }
 0x18f   : > { %v744_v21 = vadd.f32 %v738_v4, %v663_v18 }
 0x190   : > { %v740_v8 = vpop.f32.mrf.mxu1 }
 0x191   : > { %v817_v7 = vpop.f32.mrf.mxu0 }
 0x192   : > { %v741_v10 = vpop.f32.mrf.mxu1  ;;  %v824_v22 = vadd.f32 %v817_v7, %v743_v19 }
 0x193   : > { %v819_v9 = vpop.f32.mrf.mxu0 }
 0x194   : > { %v825_v24 = vadd.f32 %v819_v9, %v744_v21 }
 0x195   : > { %v821_v14 = vpop.f32.mrf.mxu0 }
 0x197   : > { %v822_v17 = vpop.f32.mrf.mxu0 }
 0x198   : > { %v898_v20 = vpop.f32.mrf.mxu1 }
 0x199   : > { %v905_v25 = vadd.f32 %v898_v20, %v824_v22 }
 0x19a   : > { %v900_v23 = vpop.f32.mrf.mxu1 }
 0x19b   : > { %v906_v29 = vadd.f32 %v900_v23, %v825_v24 }
 0x19c   : > { %v902_v28 = vpop.f32.mrf.mxu1 }
 0x19d   : > { %v979_v27 = vpop.f32.mrf.mxu0 }
 0x19e   : > { %v986_v30 = vadd.f32 %v979_v27, %v905_v25  ;;  %v903_v32 = vpop.f32.mrf.mxu1 }
 0x19f   : > { %v981_v31 = vpop.f32.mrf.mxu0 }
 0x1a0   : > { %v994_v33 = vadd.f32 %v992_v26, %v986_v30  ;;  %v987_v34 = vadd.f32 %v981_v31, %v906_v29 }
 0x1a1   : > { %v983_v35 = vpop.f32.mrf.mxu0 }
 0x1a2   : > { %v996_v36 = vsub.f32 0.0, %v994_v33  ;;  %v995_v37 = vadd.f32 %v992_v26, %v987_v34 }
 0x1a3   : > { %v984_v38 = vpop.f32.mrf.mxu0 }
 0x1a4   : > { %v998_v39 = vmul.f32 1.442695, %v996_v36  ;;  %v997_v40 = vsub.f32 0.0, %v995_v37 }
 0x1a6   : > { %1296 = vpow2.f32 %v998_v39  ;;  %v1000_v41 = vmul.f32 1.442695, %v997_v40 }
 0x1a8   : > { %1298 = vpow2.f32 %v1000_v41 }
 0x1b3   : > { %v1297_v42 = vpop.eup %1296 }
 0x1b4   : > { %v1002_v43 = vadd.f32 1.0, %v1297_v42 }
 0x1b5   : > { %v1299_v44 = vpop.eup %1298 }
 0x1b6   : > { %1300 = vrcp.f32 %v1002_v43  ;;  %v1003_v45 = vadd.f32 1.0, %v1299_v44 }
 0x1b8   : > { %1302 = vrcp.f32 %v1003_v45 }
 0x1c3   : > { %v1301_v11 = vpop.eup %1300 }
 0x1c4   : > { %v1006_v47 = vmul.f32 %v1301_v11, %v994_v33 }
 0x1c5   : > { %v1303_v46 = vpop.eup %1302 }
 0x1c6   : > { %v1007_v48 = vmul.f32 %v1303_v46, %v995_v37  ;;  %1024 = sbr.rel (!%p1482_p3) target bundleno = 487 (0x1e7), region = 100 }
 0x1c8   : > { %v1205_v49 = vpack.c.bf16 %v1007_v48, %v1006_v47 }
 0x1ca   : > { %1016 = vst [vmem:[%s1698_s6] sm:$0xff] %v1205_v49 }
 0x1cb   : > { %s1721_s4 = smov (!%p1027_p2, %s1026_s4), 2 }
 0x1cc   : > { %s1632_s10 = sshll.u32 %s1721_s4, 6 }
 0x1cd   : > { %s1031_s11 = ssub.s32 128, %s1632_s10 }
 0x1ce   : > { %1032 = vsyncadd %s1627_s22, %s1031_s11  ;;  %s1206_s8 = smul.u32 3, %s1386_s16  ;;  %p1192_p4 = scmp.ne.s32.totalorder %s1632_s10, 0 }
 0x1cf   : > { %s1700_s25 = scalar_lea.vmem [#allocation4], %s1506_s5  ;;  %s1410_s29 = smov [#allocation4]  }
 0x1d0   : > { %s1040_s9 = sshll.u32 %s1700_s25, 4  ;;  %s1035_s20 = sadd.s32 %s1206_s8, %s1190_s23  ;;  %s1041_s9 = int_to_ptr.vmem [resolvable:$true] %s1040_s9 }
 0x1d1   : > { %s1193_s15 = sshll.u32 %s1035_s20, 6  ;;  %s1304_s28 = scalar_lea.vmem %s1041_s9, %s1632_s10 }
 0x1d2   : > { %s1037_s27 = scalar_lea.hbm %s1690_s3, %s1193_s15  ;;  %p1305_p3 = scmp.ne.s32.totalorder %s1041_s9, %s1304_s28 }
 0x1d3   : > { %s1308_s6 = sshll.u32 %s1410_s29, 4  ;;  %s1309_s6 = int_to_ptr.vmem [resolvable:$false] %s1308_s6 }
 0x1d4   : > { %p1306_p5 = pnand %p1305_p3, %p1192_p4  ;;  %s1310_s7 = scalar_lea.vmem %s1309_s6, 256 }
 0x1d5   : > { %p1311_p7 = scmp.lt.s32.totalorder %s1041_s9, %s1309_s6  ;;  %p1312_p9 = scmp.lt.s32.totalorder %s1310_s7, %s1304_s28 }
 0x1d6   : > { %p1307_p6 = pneg %p1306_p5 }
 0x1d7   : > { %p1313_p10 = por %p1312_p9, %p1311_p7 }
 0x1d9   : > { %p1314_p11 = pnand %p1313_p10, %p1307_p6 }
 0x1db   : > { %1317 = shalt.err (!%p1314_p11)
}
 0x1dc   : > { %s1318_s16 = scalar_lea.hbm %s1037_s27, %s1632_s10  ;;  %s1322_s4 = scalar_lea.hbm %s1690_s3, 384 }
 0x1dd   : > { %p1319_p12 = scmp.ne.s32.totalorder %s1037_s27, %s1318_s16  ;;  %p1323_p1 = scmp.lt.s32.totalorder %s1037_s27, %s1690_s3 }
 0x1de   : > { %p1324_p2 = scmp.lt.s32.totalorder %s1322_s4, %s1318_s16 }
 0x1df   : > { %p1320_p13 = pnand %p1319_p12, %p1192_p4 }
 0x1e0   : > { %p1325_p3 = por %p1324_p2, %p1323_p1 }
 0x1e1   : > { %p1321_p0 = pneg %p1320_p13 }
 0x1e3   : > { %p1326_p5 = pnand %p1325_p3, %p1321_p0 }
 0x1e5   : > { %1329 = shalt.err (!%p1326_p5)
}
 0x1e6   : > { %1043 = dma.vmem_to_hbm [thread:$0]  (%p1192_p4), %s1041_s9, %s1632_s10, %s1037_s27, %s1627_s22  }
 0x1e7 PF: > { %p1212_p6 = scmp.ge.s32.totalorder %s1398_s19, 2  ;;  %s1052_s25 = sand.u32 1, %s1370_s12  }
 0x1e8   : > { %s1053_s20 = scalar_lea.sflag [#allocation5], %s1052_s25 }
 0x1e9   : > { %p1209_p7 = pnand %p1212_p6, %p1491_p8 }
 0x1eb   : > { %p1210_p9 = pneg %p1209_p7 }
 0x1ed   : > { %1365 = dma.done.wait (%p1210_p9), %s1053_s20, 128  }
 0x1ee   : > { %1367 = vsyncadd (%p1210_p9), %s1053_s20, 4294967168  ;;  %s16_s19 = sadd.s32 1, %s1398_s19   ;;  %s1701_s22 = sld [smem:[#allocation10_spill]] }
 0x1ef   : > { %p13_p10 = scmp.ge.s32.totalorder %s16_s19, 6   ;;  %s1702_s10 = sld [smem:[#allocation11_spill]] }
 0x1f0   : > { %s1703_s12 = smov %s1374_s13  ;;  %s1704_s13 = smov %s1378_s14 }
 0x1f1   : > { %s1705_s14 = smov %s1500_s30  ;;  %s1706_s15 = smov %s1390_s17 }
 0x1f2   : > { %s1707_s16 = smov %s1394_s18  ;;  %15 = sbr.rel (!%p13_p10) target bundleno = 5 (0x5), region = 163 }
 0x1f4   : > { %s1708_s17 = smov %s1701_s22 }
 0x1f5   : > { %s1709_s18 = smov %s1702_s10 }
 0x1f7   :  { %1058 = vsyncpa [#allocation5], 1 }
 0x1f8   :  { %1060 = vsyncpa [#allocation5 + $0x1], 1 }
 0x1f9   :  { %1061 = vsyncmov [#allocation3] }
 0x1fc   :  { %s1062_s26 = vpop.sfrf %1061 }
 0x1fd   :  { %p1198_p8 = scmp.ne.s32.totalorder %s1062_s26, 0 }
 0x1ff   :  { %1066 = shalt.err (%p1198_p8)  }
 0x200   :  { %1068 = vsyncmov [#allocation3 + $0x1] }
 0x203   :  { %s1069_s9 = vpop.sfrf %1068 }
 0x204   :  { %p1199_p4 = scmp.ne.s32.totalorder %s1069_s9, 0 }
 0x206   :  { %1073 = shalt.err (%p1199_p4)  }

</bundles_post_ra>
